<compile_context>
chip_gen: v7x
topology: tpu7x:2x2x1
jax: 0.10.0
libtpu: 0.0.40
codegen_flags: <defaults>
</compile_context>

<pallas_src>
import jax
import jax.numpy as jnp
from jax.experimental import pallas as pl
from jax.experimental.pallas import tpu as pltpu


def residual_mlp_kernel(x_ref, w1_ref, b1_ref, w2_ref, b2_ref,
                        w3_ref, b3_ref, w4_ref, b4_ref, o_ref):
    x = x_ref[...]                                                # (1, TB)  batch on lanes

    # input: Linear(1,16) — K=1, so do it as a VPU broadcast multiply-add
    # (16,1) * (1,TB) + (16,1)  ->  (16, TB)
    h0 = w1_ref[...] * x + b1_ref[...]
    residual = h0

    # hidden: ReLU -> Linear(16,16) -> ReLU -> Linear(16,16)   (lane-dense MXU matmuls)
    h = jnp.maximum(h0, 0.0)
    h = jnp.dot(w2_ref[...], h, preferred_element_type=jnp.float32) + b2_ref[...]
    h = jnp.maximum(h, 0.0)
    h = jnp.dot(w3_ref[...], h, preferred_element_type=jnp.float32) + b3_ref[...]

    # residual add
    h = h + residual

    # output: Linear(16,2) — (2,16) @ (16,TB) keeps the result lane-dense
    out = jnp.dot(w4_ref[...], h, preferred_element_type=jnp.float32) + b4_ref[...]
    o_ref[...] = out.astype(o_ref.dtype)


def residual_mlp(x, params, tb=512):
    """x: (B, 1) float32 (PyTorch layout). Returns (B, 2) float32."""
    (w1, b1, w2, b2, w3, b3, w4, b4) = params
    B = x.shape[0]

    # Tile size: multiple of 128 lanes; shrink for small batches, pad B up to a multiple.
    TB = tb
    if B < TB:
        TB = max(128, ((B + 127) // 128) * 128)
    Bp = pl.cdiv(B, TB) * TB

    # batch on lanes: (B,1) -> (1,B), zero-pad padded rows (sliced off afterwards)
    xt = x.T
    if Bp != B:
        xt = jnp.pad(xt, ((0, 0), (0, Bp - B)))

    grid = (Bp // TB,)

    # Advisory cost estimate (flops per row: 2*(16+256+256+32); bytes: x in + out + params)
    flops = 2 * B * (16 + 256 + 256 + 32)
    param_bytes = 4 * (16 + 16 + 256 + 16 + 256 + 16 + 32 + 2)
    bytes_accessed = 4 * B * (1 + 2) + param_bytes

    resident = lambda i: (0, 0)   # weights/biases: one block, DMA'd once, stays in VMEM

    out_t = pl.pallas_call(
        residual_mlp_kernel,
        out_shape=jax.ShapeDtypeStruct((2, Bp), jnp.float32),
        grid=grid,
        in_specs=[
            pl.BlockSpec((1, TB), lambda i: (0, i)),   # x tile (batch on lanes)
            pl.BlockSpec((16, 1), resident),           # w1
            pl.BlockSpec((16, 1), resident),           # b1
            pl.BlockSpec((16, 16), resident),          # w2
            pl.BlockSpec((16, 1), resident),           # b2
            pl.BlockSpec((16, 16), resident),          # w3
            pl.BlockSpec((16, 1), resident),           # b3
            pl.BlockSpec((2, 16), resident),           # w4
            pl.BlockSpec((2, 1), resident),            # b4
        ],
        out_specs=pl.BlockSpec((2, TB), lambda i: (0, i)),
        compiler_params=pltpu.CompilerParams(
            dimension_semantics=("parallel",)),        # megacore-shardable batch axis
        cost_estimate=pl.CostEstimate(
            flops=flops, transcendentals=0, bytes_accessed=bytes_accessed),
    )(xt, w1, b1, w2, b2, w3, b3, w4, b4)

    return out_t[:, :B].T                              # (B, 2)


def init_params(key):
    """PyTorch nn.Linear default init U[-1/sqrt(fan_in), 1/sqrt(fan_in)].
    Weights stored (out_features, in_features); biases (out_features, 1)."""
    def linear(key, fan_in, fan_out):
        kw, kb = jax.random.split(key)
        bound = 1.0 / jnp.sqrt(jnp.float32(fan_in))
        w = jax.random.uniform(kw, (fan_out, fan_in), jnp.float32, -bound, bound)
        b = jax.random.uniform(kb, (fan_out, 1), jnp.float32, -bound, bound)
        return w, b

    k1, k2, k3, k4 = jax.random.split(key, 4)
    w1, b1 = linear(k1, 1, 16)    # self.input
    w2, b2 = linear(k2, 16, 16)   # hidden[1]
    w3, b3 = linear(k3, 16, 16)   # hidden[3]
    w4, b4 = linear(k4, 16, 2)    # self.output
    return (w1, b1, w2, b2, w3, b3, w4, b4)


def residual_mlp_ref(x, params):
    """Pure-JAX reference matching the PyTorch forward exactly (x: (B,1))."""
    (w1, b1, w2, b2, w3, b3, w4, b4) = params
    h0 = x @ w1.T + b1.T
    residual = h0
    h = jnp.maximum(h0, 0.0)
    h = h @ w2.T + b2.T
    h = jnp.maximum(h, 0.0)
    h = h @ w3.T + b3.T
    h = h + residual
    return h @ w4.T + b4.T


if __name__ == "__main__":
    key = jax.random.PRNGKey(0)
    kx, kp = jax.random.split(key)

    B = 8
    x = jax.random.normal(kx, (B, 1), dtype=jnp.float32)   # (batch, in_features=1)
    params = init_params(kp)

    out = residual_mlp(x, params)
    out = jax.block_until_ready(out)

    ref = residual_mlp_ref(x, params)
    assert out.shape == (B, 2), out.shape
    assert jnp.allclose(out, ref, atol=1e-5, rtol=1e-5), (out, ref)

    print("KERNEL_OK")
</pallas_src>

<mosaic_0001>
module attributes {stable_mosaic.version = 11 : i64} {
  func.func @residual_mlp_kernel(%arg0: i32, %arg1: memref<1x128xf32, #tpu.memory_space<vmem>>, %arg2: memref<16x1xf32, #tpu.memory_space<vmem>>, %arg3: memref<16x1xf32, #tpu.memory_space<vmem>>, %arg4: memref<16x16xf32, #tpu.memory_space<vmem>>, %arg5: memref<16x1xf32, #tpu.memory_space<vmem>>, %arg6: memref<16x16xf32, #tpu.memory_space<vmem>>, %arg7: memref<16x1xf32, #tpu.memory_space<vmem>>, %arg8: memref<2x16xf32, #tpu.memory_space<vmem>>, %arg9: memref<2x1xf32, #tpu.memory_space<vmem>>, %arg10: memref<2x128xf32, #tpu.memory_space<vmem>>) attributes {dimension_semantics = [#tpu.dimension_semantics<parallel>], iteration_bounds = array<i64: 1>, scalar_prefetch = 0 : i64, scratch_operands = 0 : i64, tpu.core_type = #tpu.core_type<tc>, window_params = [{transform_indices = @transform_0, window_bounds = array<i64: 1, 128>}, {pipeline_mode = #tpu.pipeline_mode<synchronous>, transform_indices = @transform_1, window_bounds = array<i64: 16, 1>}, {pipeline_mode = #tpu.pipeline_mode<synchronous>, transform_indices = @transform_2, window_bounds = array<i64: 16, 1>}, {pipeline_mode = #tpu.pipeline_mode<synchronous>, transform_indices = @transform_3, window_bounds = array<i64: 16, 16>}, {pipeline_mode = #tpu.pipeline_mode<synchronous>, transform_indices = @transform_4, window_bounds = array<i64: 16, 1>}, {pipeline_mode = #tpu.pipeline_mode<synchronous>, transform_indices = @transform_5, window_bounds = array<i64: 16, 16>}, {pipeline_mode = #tpu.pipeline_mode<synchronous>, transform_indices = @transform_6, window_bounds = array<i64: 16, 1>}, {pipeline_mode = #tpu.pipeline_mode<synchronous>, transform_indices = @transform_7, window_bounds = array<i64: 2, 16>}, {pipeline_mode = #tpu.pipeline_mode<synchronous>, transform_indices = @transform_8, window_bounds = array<i64: 2, 1>}, {transform_indices = @transform_9, window_bounds = array<i64: 2, 128>}]} {
    %c0 = arith.constant 0 : index
    %c0_0 = arith.constant 0 : index
    %0 = vector.load %arg1[%c0, %c0_0] : memref<1x128xf32, #tpu.memory_space<vmem>>, vector<1x128xf32>
    %c0_1 = arith.constant 0 : index
    %c0_2 = arith.constant 0 : index
    %1 = vector.load %arg2[%c0_1, %c0_2] : memref<16x1xf32, #tpu.memory_space<vmem>>, vector<16x1xf32>
    %2 = vector.broadcast %1 : vector<16x1xf32> to vector<16x128xf32>
    %3 = vector.broadcast %0 : vector<1x128xf32> to vector<16x128xf32>
    %4 = arith.mulf %2, %3 : vector<16x128xf32>
    %c0_3 = arith.constant 0 : index
    %c0_4 = arith.constant 0 : index
    %5 = vector.load %arg3[%c0_3, %c0_4] : memref<16x1xf32, #tpu.memory_space<vmem>>, vector<16x1xf32>
    %6 = vector.broadcast %5 : vector<16x1xf32> to vector<16x128xf32>
    %7 = arith.addf %4, %6 : vector<16x128xf32>
    %cst = arith.constant 0.000000e+00 : f32
    %8 = vector.broadcast %cst : f32 to vector<16x128xf32>
    %9 = arith.maximumf %7, %8 : vector<16x128xf32>
    %c0_5 = arith.constant 0 : index
    %c0_6 = arith.constant 0 : index
    %10 = vector.load %arg4[%c0_5, %c0_6] : memref<16x16xf32, #tpu.memory_space<vmem>>, vector<16x16xf32>
    %cst_7 = arith.constant dense<0.000000e+00> : vector<16x128xf32>
    %11 = tpu.matmul %10, %9, %cst_7 {dimension_numbers = #tpu.dot_dimension_numbers<[1], [0], [0], [1], [0, 0, 1, 1], [], []>} : vector<16x16xf32>, vector<16x128xf32>, vector<16x128xf32> -> vector<16x128xf32>
    %c0_8 = arith.constant 0 : index
    %c0_9 = arith.constant 0 : index
    %12 = vector.load %arg5[%c0_8, %c0_9] : memref<16x1xf32, #tpu.memory_space<vmem>>, vector<16x1xf32>
    %13 = vector.broadcast %12 : vector<16x1xf32> to vector<16x128xf32>
    %14 = arith.addf %11, %13 : vector<16x128xf32>
    %cst_10 = arith.constant 0.000000e+00 : f32
    %15 = vector.broadcast %cst_10 : f32 to vector<16x128xf32>
    %16 = arith.maximumf %14, %15 : vector<16x128xf32>
    %c0_11 = arith.constant 0 : index
    %c0_12 = arith.constant 0 : index
    %17 = vector.load %arg6[%c0_11, %c0_12] : memref<16x16xf32, #tpu.memory_space<vmem>>, vector<16x16xf32>
    %cst_13 = arith.constant dense<0.000000e+00> : vector<16x128xf32>
    %18 = tpu.matmul %17, %16, %cst_13 {dimension_numbers = #tpu.dot_dimension_numbers<[1], [0], [0], [1], [0, 0, 1, 1], [], []>} : vector<16x16xf32>, vector<16x128xf32>, vector<16x128xf32> -> vector<16x128xf32>
    %c0_14 = arith.constant 0 : index
    %c0_15 = arith.constant 0 : index
    %19 = vector.load %arg7[%c0_14, %c0_15] : memref<16x1xf32, #tpu.memory_space<vmem>>, vector<16x1xf32>
    %20 = vector.broadcast %19 : vector<16x1xf32> to vector<16x128xf32>
    %21 = arith.addf %18, %20 : vector<16x128xf32>
    %22 = arith.addf %21, %7 : vector<16x128xf32>
    %c0_16 = arith.constant 0 : index
    %c0_17 = arith.constant 0 : index
    %23 = vector.load %arg8[%c0_16, %c0_17] : memref<2x16xf32, #tpu.memory_space<vmem>>, vector<2x16xf32>
    %cst_18 = arith.constant dense<0.000000e+00> : vector<2x128xf32>
    %24 = tpu.matmul %23, %22, %cst_18 {dimension_numbers = #tpu.dot_dimension_numbers<[1], [0], [0], [1], [0, 0, 1, 1], [], []>} : vector<2x16xf32>, vector<16x128xf32>, vector<2x128xf32> -> vector<2x128xf32>
    %c0_19 = arith.constant 0 : index
    %c0_20 = arith.constant 0 : index
    %25 = vector.load %arg9[%c0_19, %c0_20] : memref<2x1xf32, #tpu.memory_space<vmem>>, vector<2x1xf32>
    %26 = vector.broadcast %25 : vector<2x1xf32> to vector<2x128xf32>
    %27 = arith.addf %24, %26 : vector<2x128xf32>
    %c0_21 = arith.constant 0 : index
    %c0_22 = arith.constant 0 : index
    %28 = vector.load %arg10[%c0_21, %c0_22] : memref<2x128xf32, #tpu.memory_space<vmem>>, vector<2x128xf32>
    tpu.vector_store %arg10[%c0_21, %c0_22], %27 {strides = array<i32>} : memref<2x128xf32, #tpu.memory_space<vmem>>, vector<2x128xf32>,
    return
  }
  func.func @transform_0(%arg0: i32) -> (i32, i32) {
    %c0_i32 = arith.constant 0 : i32
    %c0_i32_0 = arith.constant 0 : i32
    return %c0_i32, %arg0 : i32, i32
  }
  func.func @transform_1(%arg0: i32) -> (i32, i32) {
    %c0_i32 = arith.constant 0 : i32
    %c0_i32_0 = arith.constant 0 : i32
    %c0_i32_1 = arith.constant 0 : i32
    return %c0_i32, %c0_i32_0 : i32, i32
  }
  func.func @transform_2(%arg0: i32) -> (i32, i32) {
    %c0_i32 = arith.constant 0 : i32
    %c0_i32_0 = arith.constant 0 : i32
    %c0_i32_1 = arith.constant 0 : i32
    return %c0_i32, %c0_i32_0 : i32, i32
  }
  func.func @transform_3(%arg0: i32) -> (i32, i32) {
    %c0_i32 = arith.constant 0 : i32
    %c0_i32_0 = arith.constant 0 : i32
    %c0_i32_1 = arith.constant 0 : i32
    return %c0_i32, %c0_i32_0 : i32, i32
  }
  func.func @transform_4(%arg0: i32) -> (i32, i32) {
    %c0_i32 = arith.constant 0 : i32
    %c0_i32_0 = arith.constant 0 : i32
    %c0_i32_1 = arith.constant 0 : i32
    return %c0_i32, %c0_i32_0 : i32, i32
  }
  func.func @transform_5(%arg0: i32) -> (i32, i32) {
    %c0_i32 = arith.constant 0 : i32
    %c0_i32_0 = arith.constant 0 : i32
    %c0_i32_1 = arith.constant 0 : i32
    return %c0_i32, %c0_i32_0 : i32, i32
  }
  func.func @transform_6(%arg0: i32) -> (i32, i32) {
    %c0_i32 = arith.constant 0 : i32
    %c0_i32_0 = arith.constant 0 : i32
    %c0_i32_1 = arith.constant 0 : i32
    return %c0_i32, %c0_i32_0 : i32, i32
  }
  func.func @transform_7(%arg0: i32) -> (i32, i32) {
    %c0_i32 = arith.constant 0 : i32
    %c0_i32_0 = arith.constant 0 : i32
    %c0_i32_1 = arith.constant 0 : i32
    return %c0_i32, %c0_i32_0 : i32, i32
  }
  func.func @transform_8(%arg0: i32) -> (i32, i32) {
    %c0_i32 = arith.constant 0 : i32
    %c0_i32_0 = arith.constant 0 : i32
    %c0_i32_1 = arith.constant 0 : i32
    return %c0_i32, %c0_i32_0 : i32, i32
  }
  func.func @transform_9(%arg0: i32) -> (i32, i32) {
    %c0_i32 = arith.constant 0 : i32
    %c0_i32_0 = arith.constant 0 : i32
    return %c0_i32, %arg0 : i32, i32
  }
}

</mosaic_0001>

<bundles_post_ra>
// kernel: tpu_custom_call.1
= control target key start
LH: loop header
LB: loop body
LE: loop exit
PB: predicated region body
PF: predicated region fallthrough
CT: control target
= control target key end

     0   :  { %v440_v2 = vmov 0   ;;  %s557_s0 = inlined_call_operand.vmem [shape: f32[1,128], index: 0, kind: input, shape index: {}]   ;;  %s558_s1 = inlined_call_operand.vmem [shape: f32[16,1], index: 1, kind: input, shape index: {}]   ;;  %s559_s2 = inlined_call_operand.vmem [shape: f32[16,1], index: 2, kind: input, shape index: {}]   ;;  %s560_s3 = inlined_call_operand.vmem [shape: f32[16,16], index: 3, kind: input, shape index: {}]   ;;  %s561_s4 = inlined_call_operand.vmem [shape: f32[16,1], index: 4, kind: input, shape index: {}]   ;;  %s562_s5 = inlined_call_operand.vmem [shape: f32[16,16], index: 5, kind: input, shape index: {}]   ;;  %s563_s6 = inlined_call_operand.vmem [shape: f32[16,1], index: 6, kind: input, shape index: {}]   ;;  %s564_s7 = inlined_call_operand.vmem [shape: f32[2,16], index: 7, kind: input, shape index: {}]   ;;  %s565_s8 = inlined_call_operand.vmem [shape: f32[2,1], index: 8, kind: input, shape index: {}]   ;;  %s566_s9 = inlined_call_operand.hbm [shape: f32[2,128], index: 9, kind: output, shape index: {}]  }
   0x1   :  { %v54_v0 = vld [vmem:[%s559_s2] sm:$0xff]  ;;  %415 = vset.pattern.permute.xlu1 %v440_v2  ;;  %414 = vset.pattern.permute.xlu0 %v440_v2  ;;  %v55_v3 = vld [vmem:[%s559_s2 + $0x8] sm:$0xff] }
   0x2   :  { %v34_v1 = vld [vmem:[%s558_s1] sm:$0xff]  ;;  %58 = vperm.xlu1 %415, %v54_v0   ;;  %v35_v4 = vld [vmem:[%s558_s1 + $0x8] sm:$0xff] }
   0x3   :  { %38 = vperm.xlu0 %414, %v34_v1  }
   0x4   :  { %14 = vsyncpa [#allocation3], 0  ;;  %v73_v5 = vld [vmem:[%s561_s4 + $0x8] sm:$0xff]  ;;  %v72_v6 = vld [vmem:[%s561_s4] sm:$0xff]  ;;  %vm84_vm0 = vcmask 130048   ;;  %v441_v35 = vmov 0.0|0.0  }
   0x5   :  { %v171_v7 = vld [vmem:[%s563_s6 + $0x8] sm:$0xff]  ;;  %v170_v8 = vld [vmem:[%s563_s6] sm:$0xff]  ;;  %vm442_vm1 = vmmov 0   ;;  %v443_v36 = vmov 0.0  }
   0x6   :  { %63 = vperm.xlu1 %415, %v55_v3   ;;  %v266_v9 = vld [vmem:[%s565_s8] sm:$0x3]  ;;  %v71_v23 = vld [vmem:[%s560_s3 + $0x8] sm:$0xff] }
   0x7   :  { %43 = vperm.xlu0 %414, %v35_v4   ;;  %v70_v10 = vld [vmem:[%s560_s3] sm:$0xff]  ;;  %v169_v34 = vld [vmem:[%s562_s5 + $0x8] sm:$0xff] }
   0x8   :  { %381 = vmatprep.mubr.msk.f32.mxu0 %vm84_vm0, %v70_v10  ;;  %v360_v11 = vld [vmem:[%s557_s0] ss:$0 sm:$0xff] }
   0x9   :  { %v168_v24 = vld [vmem:[%s562_s5] sm:$0xff]  ;;  %s444_s5 = smov [#allocation2]  }
   0xa   :  { %81 = vperm.xlu1 %415, %v73_v5   ;;  %388 = vmatprep.mubr.msk.f32.mxu1 %vm84_vm0, %v168_v24  ;;  %v265_v46 = vld [vmem:[%s564_s7] sm:$0x3]  ;;  %s352_s11 = sshll.u32 %s444_s5, 4  ;;  %s353_s11 = int_to_ptr.vmem [resolvable:$true] %s352_s11 }
   0xb   :  { %76 = vperm.xlu0 %414, %v72_v6   ;;  %s416_s12 = scalar_lea.vmem %s353_s11, 32  ;;  %p421_p1 = scmp.lt.s32.totalorder %s353_s11, %s353_s11 }
   0xc   :  { %p417_p0 = scmp.ne.s32.totalorder %s353_s11, %s416_s12  ;;  %p422_p2 = scmp.lt.s32.totalorder %s416_s12, %s416_s12 }
   0xe   :  { %179 = vperm.xlu1 %415, %v171_v7   ;;  %p423_p3 = por %p422_p2, %p421_p1 }
   0xf   :  { %174 = vperm.xlu0 %414, %v170_v8  }
  0x10   :  { %p424_p4 = pnand %p423_p3, %p417_p0 }
  0x13   :  { %269 = vperm.xlu0 %414, %v266_v9  }
  0x81   :  { %v59_v12 = vpop.permute.xlu1 %58 }
  0x82   :  { %v39_v13 = vpop.permute.xlu0 %38 }
  0x83   :  { %v52_v14 = vmul.f32 %v360_v11, %v39_v13 }
  0x85   :  { %v66_v16 = vadd.f32 %v59_v12, %v52_v14  ;;  %v64_v18 = vpop.permute.xlu1 %63 }
  0x86   :  { %v44_v15 = vpop.permute.xlu0 %43 }
  0x87   :  { %v53_v17 = vmul.f32 %v360_v11, %v44_v15  ;;  %v68_v20 = vmax.f32 %v66_v16, 0.0 }
  0x89   :  { %v67_v19 = vadd.f32 %v64_v18, %v53_v17  ;;  %v82_v25 = vpop.permute.xlu1 %81 }
  0x8a   :  { %v77_v27 = vpop.permute.xlu0 %76 }
  0x8b   :  { %v69_v21 = vmax.f32 %v67_v19, 0.0 }
  0x8d   :  { %v398_v22 = vpack.c.bf16 %v69_v21, %v68_v20  ;;  %v180_v37 = vpop.permute.xlu1 %179 }
  0x8e   :  { %v175_v39 = vpop.permute.xlu0 %174 }
  0x8f   :  { %399 = vmatprep.subr.bf16.mxu0 %v398_v22 }
  0x90   :  { %401 = vmatpush3.bf16.msra.mxu0 %v398_v22 }
  0x91   :  { %406 = vmatprep.subr.bf16.mxu0 %v441_v35 }
  0x92   :  { %v270_v47 = vpop.permute.xlu0 %269 }
  0x93   :  { %382 = vmatmul.mubr.msk.f32.vlgmr.msra.gmra.mrb[0].mxu0 %vm84_vm0, %v71_v23 }
  0x94   :  { %395 = vmatprep.mubr.msk.f32.mxu0 %vm442_vm1, %v443_v36 }
 0x166   :  { %v383_v26 = vpop.f32.mrb[0].mxu0 }
 0x167   :  { %v163_v28 = vadd.f32 %v383_v26, %v82_v25  ;;  %v157_v29 = vpop.f32.mrb[1].mxu0 }
 0x168   :  { %v158_v30 = vadd.f32 %v157_v29, %v77_v27 }
 0x169   :  { %v167_v31 = vmax.f32 %v163_v28, 0.0 }
 0x16a   :  { %v166_v32 = vmax.f32 %v158_v30, 0.0 }
 0x16c   :  { %v402_v33 = vpack.c.bf16 %v167_v31, %v166_v32 }
 0x16e   :  { %403 = vmatprep.subr.bf16.mxu1 %v402_v33 }
 0x16f   :  { %405 = vmatpush3.bf16.msra.mxu1 %v402_v33 }
 0x172   :  { %389 = vmatmul.mubr.msk.f32.vlgmr.msra.gmra.mrb[0].mxu1 %vm84_vm0, %v169_v34 }
 0x245   :  { %v390_v38 = vpop.f32.mrb[0].mxu1 }
 0x246   :  { %v260_v40 = vadd.f32 %v390_v38, %v180_v37  ;;  %v254_v41 = vpop.f32.mrb[1].mxu1 }
 0x247   :  { %v255_v42 = vadd.f32 %v254_v41, %v175_v39 }
 0x248   :  { %v264_v43 = vadd.f32 %v260_v40, %v67_v19 }
 0x249   :  { %v263_v44 = vadd.f32 %v255_v42, %v66_v16 }
 0x24b   :  { %v407_v45 = vpack.c.bf16 %v264_v43, %v263_v44 }
 0x24d   :  { %408 = vmatpush3.bf16.msra.mxu0 %v407_v45 }
 0x250   :  { %396 = vmatmul.mubr.msk.f32.vlgmr.msra.gmra.mrb[2].mxu0 %vm84_vm0, %v265_v46 }
 0x323   :  { %v341_v48 = vpop.f32.mrb[2].mxu0 }
 0x324   :  { %v342_v49 = vadd.f32 %v341_v48, %v270_v47  ;;  %v397_v50 = vpop.f32.mrb[3].mxu0 }
 0x326   :  { %345 = vst [vmem:[#allocation2] sm:$0x3] %v342_v49 }
 0x327   :  { %427 = shalt.err (!%p424_p4)
}
 0x328   :  { %s428_s7 = scalar_lea.hbm %s566_s9, 32 }
 0x329   :  { %p429_p5 = scmp.ne.s32.totalorder %s566_s9, %s428_s7  ;;  %p432_p6 = scmp.lt.u32.totalorder %s428_s7, %s566_s9 }
 0x32b   :  { %p434_p7 = pnand %p432_p6, %p429_p5 }
 0x32d   :  { %437 = shalt.err (!%p434_p7)
}
 0x32e   :  { %355 = dma.vmem_to_hbm [thread:$0]  %s353_s11, 32, %s566_s9, [#allocation3]  }
 0x32f   :  { %438 = dma.done.wait [#allocation3], 32  }
 0x330   :  { %439 = vsyncadd [#allocation3], 4294967264 }
 0x331   :  { %359 = vsyncpa [#allocation3], 1 }

</bundles_post_ra>
